<compile_context>
chip_gen: v7x
topology: tpu7x:2x2x1
jax: 0.10.0
libtpu: 0.0.40
codegen_flags: <defaults>
</compile_context>

<pallas_src>
import jax
import jax.numpy as jnp
from jax.experimental import pallas as pl
from jax.experimental.pallas import tpu as pltpu


def final_layer_kernel(x_ref, t_ref, wy_ref, inv2_ref, bias_ref, o_ref):
    # x_ref   : (1, n, Bt)       observation locations, lane = local batch
    # t_ref   : (1, 1, m*Bt)     target locations, lane = j*Bt + b  (lane-dense)
    # wy_ref  : (1, C, n, Bt)    W[c] * y[b, i, c], channel-major
    # inv2_ref: (C,)  SMEM       1 / exp(sigma[c])^2
    # bias_ref: (1,)  SMEM       linear bias
    # o_ref   : (1, 1, m*Bt)     lane-dense output rows
    _, n, Bt = x_ref.shape
    m_bt = t_ref.shape[-1]
    C = wy_ref.shape[1]
    m = m_bt // Bt                                   # static

    x_nb = x_ref[0]                                  # (n, Bt)
    t_row = t_ref[0]                                 # (1, m*Bt)
    wy = wy_ref[0]                                   # (C, n, Bt)

    # Repeat the Bt-wide lane block m times -> full-width (n, m*Bt) slabs.
    x_bc = jnp.tile(x_nb, (1, m))                    # x[b,i] at lane j*Bt+b
    # Hoisted out of the channel loop: -0.5 * (x - t)^2, broadcast over rows.
    neg_half = -0.5 * (x_bc - t_row) ** 2            # (n, m*Bt)

    acc = jnp.zeros((n, m_bt), jnp.float32)          # deferred n-reduction
    for c in range(C):                               # C is small & static
        psi = jnp.exp(neg_half * inv2_ref[c])        # RBF weights (EUP, full lanes)
        acc = acc + jnp.tile(wy[c], (1, m)) * psi    # XLU tile overlaps with exp
    # Single sublane reduce over n -> already lane-dense (1, m*Bt).
    o_ref[0] = jnp.sum(acc, axis=0, keepdims=True) + bias_ref[0]


def _pick_block_b(B, n, m, C, *, num_cores=2, step_overhead_cycles=600):
    """Batches per grid step.

    Collapse to a single grid step unless splitting across TensorCores gives
    each core clearly more work than the ~0.35us per-step overhead.  v5e/v6e
    have one TC so a single step is always right for small shapes; on v7x we
    conservatively assume 2 TCs and only split when per-core work is large
    (for large work the extra ~600-cycle step on v5e/v6e is negligible).
    """
    def work_cycles(bt):
        # Per channel, per (8,128) vreg: ~1 exp + a few VALU ops (~10 cycles).
        vregs = pl.cdiv(n, 8) * pl.cdiv(max(m * bt, 1), 128)
        return C * vregs * 10

    if num_cores <= 1 or B < 2:
        return B
    half = max(1, B // num_cores)
    if work_cycles(half) < 2 * step_overhead_cycles:
        return B                                      # single grid step
    for bt in range(half, 0, -1):
        if B % bt == 0:
            return bt
    return B


def final_layer(x, y, t, sigma, w, b, *, block_b=None):
    """x: (B, n, 1), y: (B, n, C), t: (B, m, 1)  ->  (B, m, 1)."""
    B, n, _ = x.shape
    _, m, _ = t.shape
    C = y.shape[-1]
    if block_b is None:
        block_b = _pick_block_b(B, n, m, C)
    assert B % block_b == 0, (B, block_b)
    G = B // block_b
    f32 = jnp.float32

    # Lane packing: within a group of block_b batches, lane index = j*block_b + b.
    # x_g[g, i, bl]              = x[g*block_b+bl, i, 0]
    x_g = jnp.transpose(x.reshape(G, block_b, n), (0, 2, 1)).astype(f32)
    # t_g[g, 0, j*block_b+bl]    = t[g*block_b+bl, j, 0]
    t_g = jnp.transpose(t.reshape(G, block_b, m), (0, 2, 1)) \
             .reshape(G, 1, m * block_b).astype(f32)
    # Fold the Linear(C->1) weight into y once, then channel-major layout:
    # wy_g[g, c, i, bl]          = W[c] * y[g*block_b+bl, i, c]
    wy = y.astype(f32) * w.reshape(1, 1, C).astype(f32)
    wy_g = jnp.transpose(wy.reshape(G, block_b, n, C), (0, 3, 2, 1))
    # TODO(synk): for production-sized y, move this relayout into the kernel
    # (read the original (b, n, C) layout and transpose in VMEM) to avoid an
    # extra wrapper-side HBM pass over y.

    inv2 = jnp.exp(-2.0 * sigma).astype(f32)          # 1 / exp(sigma)^2, (C,)
    bias = b.reshape(1).astype(f32)

    smem = pl.BlockSpec(memory_space=pltpu.MemorySpace.SMEM)
    out_g = pl.pallas_call(
        final_layer_kernel,
        out_shape=jax.ShapeDtypeStruct((G, 1, m * block_b), f32),
        grid=(G,),
        in_specs=[
            pl.BlockSpec((1, n, block_b), lambda g: (g, 0, 0)),            # x_g
            pl.BlockSpec((1, 1, m * block_b), lambda g: (g, 0, 0)),        # t_g
            pl.BlockSpec((1, C, n, block_b), lambda g: (g, 0, 0, 0)),      # wy_g
            smem,                                                          # inv2
            smem,                                                          # bias
        ],
        out_specs=pl.BlockSpec((1, 1, m * block_b), lambda g: (g, 0, 0)),
        compiler_params=pltpu.CompilerParams(dimension_semantics=("parallel",)),
    )(x_g, t_g, wy_g, inv2, bias)

    # (G, 1, m*block_b) with lane = j*block_b + bl  ->  (B, m, 1)
    out = jnp.transpose(out_g.reshape(G, m, block_b), (0, 2, 1)).reshape(B, m, 1)
    return out


def reference(x, y, t, sigma, w, b):
    """Pure-JAX mirror of the PyTorch forward pass."""
    dists = (x - jnp.transpose(t, (0, 2, 1))) ** 2            # (B, n, m)
    scales = jnp.exp(sigma)[None, None, None, :]              # (1,1,1,C)
    wt = jnp.exp(-0.5 * dists[..., None] / scales ** 2)       # (B, n, m, C)
    y_out = (y[:, :, None, :] * wt).sum(axis=1)               # (B, m, C)
    return y_out @ w.reshape(-1, 1) + b.reshape(1)            # (B, m, 1)


if __name__ == "__main__":
    B, n, m, C = 4, 16, 16, 4        # batch, n context, m targets, in_channels
    init_length_scale = 0.5

    key = jax.random.PRNGKey(0)
    kx, ky, kt, kw = jax.random.split(key, 4)
    x = jax.random.normal(kx, (B, n, 1), jnp.float32)
    y = jax.random.normal(ky, (B, n, C), jnp.float32)
    t = jax.random.normal(kt, (B, m, 1), jnp.float32)

    # Deterministic parameters matching the module's shapes:
    #   sigma = log(init_length_scale) * ones(C);  Linear(C,1): weight (1,C), bias (1,)
    sigma = jnp.full((C,), jnp.log(init_length_scale), jnp.float32)
    w = jax.random.normal(kw, (1, C), jnp.float32) / jnp.sqrt(C)
    b = jnp.array([0.01], jnp.float32)

    out = jax.block_until_ready(final_layer(x, y, t, sigma, w, b))
    ref = reference(x, y, t, sigma, w, b)

    assert out.shape == (B, m, 1), out.shape
    assert jnp.allclose(out, ref, atol=1e-4, rtol=1e-4), float(jnp.abs(out - ref).max())
    print("KERNEL_OK")
</pallas_src>

<mosaic_0001>
module attributes {stable_mosaic.version = 11 : i64} {
  func.func @final_layer_kernel(%arg0: i32, %arg1: memref<1x16x4xf32, #tpu.memory_space<vmem>>, %arg2: memref<1x1x64xf32, #tpu.memory_space<vmem>>, %arg3: memref<1x4x16x4xf32, #tpu.memory_space<vmem>>, %arg4: memref<4xf32, #tpu.memory_space<smem>>, %arg5: memref<1xf32, #tpu.memory_space<smem>>, %arg6: memref<1x1x64xf32, #tpu.memory_space<vmem>>) attributes {dimension_semantics = [#tpu.dimension_semantics<parallel>], iteration_bounds = array<i64: 1>, scalar_prefetch = 0 : i64, scratch_operands = 0 : i64, tpu.core_type = #tpu.core_type<tc>, window_params = [{transform_indices = @transform_0, window_bounds = array<i64: 1, 16, 4>}, {transform_indices = @transform_1, window_bounds = array<i64: 1, 1, 64>}, {transform_indices = @transform_2, window_bounds = array<i64: 1, 4, 16, 4>}, {transform_indices = @transform_3, window_bounds = array<i64: 4>}, {transform_indices = @transform_4, window_bounds = array<i64: 1>}, {transform_indices = @transform_5, window_bounds = array<i64: 1, 1, 64>}]} {
    %c0 = arith.constant 0 : index
    %c0_0 = arith.constant 0 : index
    %c0_1 = arith.constant 0 : index
    %0 = vector.load %arg1[%c0, %c0_0, %c0_1] : memref<1x16x4xf32, #tpu.memory_space<vmem>>, vector<1x16x4xf32>
    %1 = vector.shape_cast %0 : vector<1x16x4xf32> to vector<16x4xf32>
    %c0_2 = arith.constant 0 : index
    %c0_3 = arith.constant 0 : index
    %c0_4 = arith.constant 0 : index
    %2 = vector.load %arg2[%c0_2, %c0_3, %c0_4] : memref<1x1x64xf32, #tpu.memory_space<vmem>>, vector<1x1x64xf32>
    %3 = vector.shape_cast %2 : vector<1x1x64xf32> to vector<1x64xf32>
    %c0_5 = arith.constant 0 : index
    %c0_6 = arith.constant 0 : index
    %c0_7 = arith.constant 0 : index
    %c0_8 = arith.constant 0 : index
    %4 = vector.load %arg3[%c0_5, %c0_6, %c0_7, %c0_8] : memref<1x4x16x4xf32, #tpu.memory_space<vmem>>, vector<1x4x16x4xf32>
    %5 = vector.shape_cast %4 : vector<1x4x16x4xf32> to vector<4x16x4xf32>
    %6 = tpu.concatenate %1, %1, %1, %1, %1, %1, %1, %1, %1, %1, %1, %1, %1, %1, %1, %1 in 1 : vector<16x4xf32>, vector<16x4xf32>, vector<16x4xf32>, vector<16x4xf32>, vector<16x4xf32>, vector<16x4xf32>, vector<16x4xf32>, vector<16x4xf32>, vector<16x4xf32>, vector<16x4xf32>, vector<16x4xf32>, vector<16x4xf32>, vector<16x4xf32>, vector<16x4xf32>, vector<16x4xf32>, vector<16x4xf32> -> vector<16x64xf32>
    %7 = vector.broadcast %3 : vector<1x64xf32> to vector<16x64xf32>
    %8 = arith.subf %6, %7 : vector<16x64xf32>
    %9 = arith.mulf %8, %8 : vector<16x64xf32>
    %cst = arith.constant -5.000000e-01 : f32
    %10 = vector.broadcast %cst : f32 to vector<16x64xf32>
    %11 = arith.mulf %10, %9 : vector<16x64xf32>
    %cst_9 = arith.constant 0.000000e+00 : f32
    %12 = vector.broadcast %cst_9 : f32 to vector<16x64xf32>
    %c0_10 = arith.constant 0 : index
    %13 = memref.load %arg4[%c0_10] : memref<4xf32, #tpu.memory_space<smem>>
    %14 = vector.broadcast %13 : f32 to vector<16x64xf32>
    %15 = arith.mulf %11, %14 : vector<16x64xf32>
    %16 = math.exp %15 : vector<16x64xf32>
    %17 = vector.extract_strided_slice %5 {offsets = [0, 0, 0], sizes = [1, 16, 4], strides = [1, 1, 1]} : vector<4x16x4xf32> to vector<1x16x4xf32>
    %18 = vector.shape_cast %17 : vector<1x16x4xf32> to vector<16x4xf32>
    %19 = tpu.concatenate %18, %18, %18, %18, %18, %18, %18, %18, %18, %18, %18, %18, %18, %18, %18, %18 in 1 : vector<16x4xf32>, vector<16x4xf32>, vector<16x4xf32>, vector<16x4xf32>, vector<16x4xf32>, vector<16x4xf32>, vector<16x4xf32>, vector<16x4xf32>, vector<16x4xf32>, vector<16x4xf32>, vector<16x4xf32>, vector<16x4xf32>, vector<16x4xf32>, vector<16x4xf32>, vector<16x4xf32>, vector<16x4xf32> -> vector<16x64xf32>
    %20 = arith.mulf %19, %16 : vector<16x64xf32>
    %21 = arith.addf %12, %20 : vector<16x64xf32>
    %c1 = arith.constant 1 : index
    %22 = memref.load %arg4[%c1] : memref<4xf32, #tpu.memory_space<smem>>
    %23 = vector.broadcast %22 : f32 to vector<16x64xf32>
    %24 = arith.mulf %11, %23 : vector<16x64xf32>
    %25 = math.exp %24 : vector<16x64xf32>
    %26 = vector.extract_strided_slice %5 {offsets = [1, 0, 0], sizes = [1, 16, 4], strides = [1, 1, 1]} : vector<4x16x4xf32> to vector<1x16x4xf32>
    %27 = vector.shape_cast %26 : vector<1x16x4xf32> to vector<16x4xf32>
    %28 = tpu.concatenate %27, %27, %27, %27, %27, %27, %27, %27, %27, %27, %27, %27, %27, %27, %27, %27 in 1 : vector<16x4xf32>, vector<16x4xf32>, vector<16x4xf32>, vector<16x4xf32>, vector<16x4xf32>, vector<16x4xf32>, vector<16x4xf32>, vector<16x4xf32>, vector<16x4xf32>, vector<16x4xf32>, vector<16x4xf32>, vector<16x4xf32>, vector<16x4xf32>, vector<16x4xf32>, vector<16x4xf32>, vector<16x4xf32> -> vector<16x64xf32>
    %29 = arith.mulf %28, %25 : vector<16x64xf32>
    %30 = arith.addf %21, %29 : vector<16x64xf32>
    %c2 = arith.constant 2 : index
    %31 = memref.load %arg4[%c2] : memref<4xf32, #tpu.memory_space<smem>>
    %32 = vector.broadcast %31 : f32 to vector<16x64xf32>
    %33 = arith.mulf %11, %32 : vector<16x64xf32>
    %34 = math.exp %33 : vector<16x64xf32>
    %35 = vector.extract_strided_slice %5 {offsets = [2, 0, 0], sizes = [1, 16, 4], strides = [1, 1, 1]} : vector<4x16x4xf32> to vector<1x16x4xf32>
    %36 = vector.shape_cast %35 : vector<1x16x4xf32> to vector<16x4xf32>
    %37 = tpu.concatenate %36, %36, %36, %36, %36, %36, %36, %36, %36, %36, %36, %36, %36, %36, %36, %36 in 1 : vector<16x4xf32>, vector<16x4xf32>, vector<16x4xf32>, vector<16x4xf32>, vector<16x4xf32>, vector<16x4xf32>, vector<16x4xf32>, vector<16x4xf32>, vector<16x4xf32>, vector<16x4xf32>, vector<16x4xf32>, vector<16x4xf32>, vector<16x4xf32>, vector<16x4xf32>, vector<16x4xf32>, vector<16x4xf32> -> vector<16x64xf32>
    %38 = arith.mulf %37, %34 : vector<16x64xf32>
    %39 = arith.addf %30, %38 : vector<16x64xf32>
    %c3 = arith.constant 3 : index
    %40 = memref.load %arg4[%c3] : memref<4xf32, #tpu.memory_space<smem>>
    %41 = vector.broadcast %40 : f32 to vector<16x64xf32>
    %42 = arith.mulf %11, %41 : vector<16x64xf32>
    %43 = math.exp %42 : vector<16x64xf32>
    %44 = vector.extract_strided_slice %5 {offsets = [3, 0, 0], sizes = [1, 16, 4], strides = [1, 1, 1]} : vector<4x16x4xf32> to vector<1x16x4xf32>
    %45 = vector.shape_cast %44 : vector<1x16x4xf32> to vector<16x4xf32>
    %46 = tpu.concatenate %45, %45, %45, %45, %45, %45, %45, %45, %45, %45, %45, %45, %45, %45, %45, %45 in 1 : vector<16x4xf32>, vector<16x4xf32>, vector<16x4xf32>, vector<16x4xf32>, vector<16x4xf32>, vector<16x4xf32>, vector<16x4xf32>, vector<16x4xf32>, vector<16x4xf32>, vector<16x4xf32>, vector<16x4xf32>, vector<16x4xf32>, vector<16x4xf32>, vector<16x4xf32>, vector<16x4xf32>, vector<16x4xf32> -> vector<16x64xf32>
    %47 = arith.mulf %46, %43 : vector<16x64xf32>
    %48 = arith.addf %39, %47 : vector<16x64xf32>
    %cst_11 = arith.constant dense<0.000000e+00> : vector<64xf32>
    %49 = vector.multi_reduction <add>, %48, %cst_11 [0] : vector<16x64xf32> to vector<64xf32>
    %50 = vector.shape_cast %49 : vector<64xf32> to vector<1x64xf32>
    %c0_12 = arith.constant 0 : index
    %51 = memref.load %arg5[%c0_12] : memref<1xf32, #tpu.memory_space<smem>>
    %52 = vector.broadcast %51 : f32 to vector<1x64xf32>
    %53 = arith.addf %50, %52 : vector<1x64xf32>
    %c0_13 = arith.constant 0 : index
    %c0_14 = arith.constant 0 : index
    %c0_15 = arith.constant 0 : index
    %54 = vector.load %arg6[%c0_13, %c0_14, %c0_15] : memref<1x1x64xf32, #tpu.memory_space<vmem>>, vector<1x1x64xf32>
    %55 = vector.shape_cast %54 : vector<1x1x64xf32> to vector<1x64xf32>
    %56 = vector.shape_cast %53 : vector<1x64xf32> to vector<1x1x64xf32>
    tpu.vector_store %arg6[%c0_13, %c0_14, %c0_15], %56 {strides = array<i32>} : memref<1x1x64xf32, #tpu.memory_space<vmem>>, vector<1x1x64xf32>,
    return
  }
  func.func @transform_0(%arg0: i32) -> (i32, i32, i32) {
    %c0_i32 = arith.constant 0 : i32
    %c0_i32_0 = arith.constant 0 : i32
    %c0_i32_1 = arith.constant 0 : i32
    return %arg0, %c0_i32, %c0_i32_0 : i32, i32, i32
  }
  func.func @transform_1(%arg0: i32) -> (i32, i32, i32) {
    %c0_i32 = arith.constant 0 : i32
    %c0_i32_0 = arith.constant 0 : i32
    %c0_i32_1 = arith.constant 0 : i32
    return %arg0, %c0_i32, %c0_i32_0 : i32, i32, i32
  }
  func.func @transform_2(%arg0: i32) -> (i32, i32, i32, i32) {
    %c0_i32 = arith.constant 0 : i32
    %c0_i32_0 = arith.constant 0 : i32
    %c0_i32_1 = arith.constant 0 : i32
    %c0_i32_2 = arith.constant 0 : i32
    return %arg0, %c0_i32, %c0_i32_0, %c0_i32_1 : i32, i32, i32, i32
  }
  func.func @transform_3(%arg0: i32) -> i32 {
    %c0_i32 = arith.constant 0 : i32
    %c0_i32_0 = arith.constant 0 : i32
    return %c0_i32 : i32
  }
  func.func @transform_4(%arg0: i32) -> i32 {
    %c0_i32 = arith.constant 0 : i32
    %c0_i32_0 = arith.constant 0 : i32
    return %c0_i32 : i32
  }
  func.func @transform_5(%arg0: i32) -> (i32, i32, i32) {
    %c0_i32 = arith.constant 0 : i32
    %c0_i32_0 = arith.constant 0 : i32
    %c0_i32_1 = arith.constant 0 : i32
    return %arg0, %c0_i32, %c0_i32_0 : i32, i32, i32
  }
}

</mosaic_0001>

<bundles_post_ra>
// kernel: tpu_custom_call.1
= control target key start
LH: loop header
LB: loop body
LE: loop exit
PB: predicated region body
PF: predicated region fallthrough
CT: control target
= control target key end

     0   :  { %11 = vsyncpa [#allocation5], 0  ;;  %s1570_s0 = inlined_call_operand.vmem [shape: f32[1,16,4], index: 0, kind: input, shape index: {}]   ;;  %s1571_s1 = inlined_call_operand.vmem [shape: f32[1,1,64], index: 1, kind: input, shape index: {}]   ;;  %s1572_s2 = inlined_call_operand.vmem [shape: f32[1,4,16,4], index: 2, kind: input, shape index: {}]   ;;  %s1573_s3 = inlined_call_operand.vmem [shape: f32[4], index: 3, kind: input, shape index: {}]   ;;  %s1574_s4 = inlined_call_operand.<no memory space> [shape: f32[1], index: 4, kind: input, shape index: {}]   ;;  %s1575_s5 = inlined_call_operand.hbm [shape: f32[1,1,64], index: 5, kind: output, shape index: {}]  }
   0x1   :  { %12 = vsyncpa [#allocation4], 0  ;;  %s25_s20 = sshll.u32 %s1573_s3, 4  ;;  %s26_s20 = int_to_ptr.vmem [resolvable:$true] %s25_s20 }
   0x2   :  { %s798_s21 = scalar_lea.vmem %s26_s20, 16  ;;  %p803_p1 = scmp.lt.s32.totalorder %s26_s20, %s26_s20 }
   0x3   :  { %p799_p0 = scmp.ne.s32.totalorder %s26_s20, %s798_s21  ;;  %p804_p2 = scmp.lt.s32.totalorder %s798_s21, %s798_s21 }
   0x5   :  { %p805_p3 = por %p804_p2, %p803_p1 }
   0x7   :  { %p806_p4 = pnand %p805_p3, %p799_p0 }
   0x9   :  { %809 = shalt.err (!%p806_p4)
}
   0xa   :  { %s836_s22 = smov [#allocation3]  }
   0xb   :  { %28 = dma.vmem_to_smem %s26_s20, 16, %s836_s22, [#allocation5]  }
   0xc   :  { %832 = dma.done.wait [#allocation5], 16  }
   0xd   :  { %833 = vsyncadd [#allocation5], 4294967280 }
   0xe   :  { %34 = sfence }
   0xf   :  { %v889_v0 = vld [vmem:[%s1570_s0] sm:$0xff]  ;;  %s837_s25 = smov 8   ;;  %s838_s3 = smov 4   ;;  %v898_v1 = vld [vmem:[%s1570_s0 + $0x8] sm:$0xff]  ;;  %v1033_v6 = vld [vmem:[%s1572_s2 + $0x18] sm:$0xff]  ;;  %vm138_vm0 = vcmask 31744  }
  0x10   :  { %54 = vrot.lane.b32.xlu1 %v889_v0, %s837_s25  ;;  %48 = vrot.lane.b32.xlu0 %v889_v0, %s838_s3  ;;  %s839_s28 = smov 12   ;;  %s840_s29 = smov 16   ;;  %v959_v2 = vld [vmem:[%s1572_s2 + $0x8] sm:$0xff]  ;;  %v964_v3 = vld [vmem:[%s1572_s2] sm:$0xff]  ;;  %vm141_vm1 = vcmask 64512   ;;  %vm144_vm2 = vcmask 97280  }
  0x11   :  { %s841_s0 = smov 20   ;;  %s842_s30 = smov 24   ;;  %v1038_v7 = vld [vmem:[%s1572_s2 + $0x10] sm:$0xff]  ;;  %v1159_v38 = vld [vmem:[%s1572_s2 + $0x28] sm:$0xff]  ;;  %v1164_v39 = vld [vmem:[%s1572_s2 + $0x20] sm:$0xff]  ;;  %vm147_vm3 = vcmask 130048  }
  0x12   :  { %s843_s6 = smov 28   ;;  %s844_s7 = smov 32   ;;  %v1193_v52 = vld [vmem:[%s1572_s2 + $0x30] sm:$0xff]  ;;  %v1202_v55 = vld [vmem:[%s1572_s2 + $0x38] sm:$0xff]  ;;  %vm150_vm4 = vcmask 162816   ;;  %vm153_vm5 = vcmask 195584  }
  0x13   :  { %s845_s8 = smov 36   ;;  %s846_s9 = smov 40   ;;  %vm156_vm6 = vcmask 228352   ;;  %vm159_vm7 = vcmask 261120   ;;  %vm162_vm8 = vcmask 293888   ;;  %vm165_vm9 = vcmask 326656  }
  0x14   :  { %56 = vrot.lane.b32.xlu1 %v898_v1, %s837_s25  ;;  %50 = vrot.lane.b32.xlu0 %v898_v1, %s838_s3  ;;  %s847_s10 = smov 44   ;;  %s848_s11 = smov 48   ;;  %vm168_vm10 = vcmask 359424   ;;  %vm171_vm11 = vcmask 392192   ;;  %vm174_vm12 = vcmask 424960   ;;  %vm177_vm13 = vcmask 457728  }
  0x15   :  { %s849_s12 = smov 52   ;;  %s850_s13 = smov 56   ;;  %vm180_vm14 = vcmask 490496   ;;  %vm731_vm15 = vcmask 523264  }
  0x16   :  { %s851_s14 = smov 60  }
  0x18   :  { %62 = vrot.lane.b32.xlu1 %v898_v1, %s839_s28  ;;  %60 = vrot.lane.b32.xlu0 %v889_v0, %s839_s28 }
  0x1c   :  { %68 = vrot.lane.b32.xlu1 %v898_v1, %s840_s29  ;;  %66 = vrot.lane.b32.xlu0 %v889_v0, %s840_s29 }
  0x20   :  { %74 = vrot.lane.b32.xlu1 %v898_v1, %s841_s0  ;;  %72 = vrot.lane.b32.xlu0 %v889_v0, %s841_s0 }
  0x24   :  { %80 = vrot.lane.b32.xlu1 %v898_v1, %s842_s30  ;;  %78 = vrot.lane.b32.xlu0 %v889_v0, %s842_s30 }
  0x28   :  { %86 = vrot.lane.b32.xlu1 %v898_v1, %s843_s6  ;;  %84 = vrot.lane.b32.xlu0 %v889_v0, %s843_s6 }
  0x2c   :  { %92 = vrot.lane.b32.xlu1 %v898_v1, %s844_s7  ;;  %90 = vrot.lane.b32.xlu0 %v889_v0, %s844_s7 }
  0x30   :  { %98 = vrot.lane.b32.xlu1 %v898_v1, %s845_s8  ;;  %96 = vrot.lane.b32.xlu0 %v889_v0, %s845_s8 }
  0x34   :  { %104 = vrot.lane.b32.xlu1 %v898_v1, %s846_s9  ;;  %102 = vrot.lane.b32.xlu0 %v889_v0, %s846_s9 }
  0x38   :  { %110 = vrot.lane.b32.xlu1 %v898_v1, %s847_s10  ;;  %108 = vrot.lane.b32.xlu0 %v889_v0, %s847_s10 }
  0x3c   :  { %116 = vrot.lane.b32.xlu1 %v898_v1, %s848_s11  ;;  %114 = vrot.lane.b32.xlu0 %v889_v0, %s848_s11 }
  0x40   :  { %122 = vrot.lane.b32.xlu1 %v898_v1, %s849_s12  ;;  %120 = vrot.lane.b32.xlu0 %v889_v0, %s849_s12 }
  0x44   :  { %128 = vrot.lane.b32.xlu1 %v898_v1, %s850_s13  ;;  %126 = vrot.lane.b32.xlu0 %v889_v0, %s850_s13 }
  0x48   :  { %134 = vrot.lane.b32.xlu1 %v898_v1, %s851_s14  ;;  %132 = vrot.lane.b32.xlu0 %v889_v0, %s851_s14 }
  0x4c   :  { %207 = vrot.lane.b32.xlu1 %v959_v2, %s838_s3  ;;  %205 = vrot.lane.b32.xlu0 %v964_v3, %s838_s3 }
  0x50   :  { %213 = vrot.lane.b32.xlu1 %v959_v2, %s837_s25  ;;  %211 = vrot.lane.b32.xlu0 %v964_v3, %s837_s25 }
  0x54   :  { %219 = vrot.lane.b32.xlu1 %v959_v2, %s839_s28  ;;  %217 = vrot.lane.b32.xlu0 %v964_v3, %s839_s28 }
  0x58   :  { %225 = vrot.lane.b32.xlu1 %v959_v2, %s840_s29  ;;  %223 = vrot.lane.b32.xlu0 %v964_v3, %s840_s29 }
  0x5c   :  { %231 = vrot.lane.b32.xlu1 %v959_v2, %s841_s0  ;;  %229 = vrot.lane.b32.xlu0 %v964_v3, %s841_s0 }
  0x60   :  { %237 = vrot.lane.b32.xlu1 %v959_v2, %s842_s30  ;;  %235 = vrot.lane.b32.xlu0 %v964_v3, %s842_s30 }
  0x64   :  { %243 = vrot.lane.b32.xlu1 %v959_v2, %s843_s6  ;;  %241 = vrot.lane.b32.xlu0 %v964_v3, %s843_s6 }
  0x68   :  { %249 = vrot.lane.b32.xlu1 %v959_v2, %s844_s7  ;;  %247 = vrot.lane.b32.xlu0 %v964_v3, %s844_s7 }
  0x6c   :  { %255 = vrot.lane.b32.xlu1 %v959_v2, %s845_s8  ;;  %253 = vrot.lane.b32.xlu0 %v964_v3, %s845_s8 }
  0x70   :  { %261 = vrot.lane.b32.xlu1 %v959_v2, %s846_s9  ;;  %259 = vrot.lane.b32.xlu0 %v964_v3, %s846_s9 }
  0x74   :  { %267 = vrot.lane.b32.xlu1 %v959_v2, %s847_s10  ;;  %265 = vrot.lane.b32.xlu0 %v964_v3, %s847_s10 }
  0x78   :  { %273 = vrot.lane.b32.xlu1 %v959_v2, %s848_s11  ;;  %271 = vrot.lane.b32.xlu0 %v964_v3, %s848_s11 }
  0x7c   :  { %279 = vrot.lane.b32.xlu1 %v959_v2, %s849_s12  ;;  %277 = vrot.lane.b32.xlu0 %v964_v3, %s849_s12 }
  0x80   :  { %285 = vrot.lane.b32.xlu1 %v959_v2, %s850_s13  ;;  %283 = vrot.lane.b32.xlu0 %v964_v3, %s850_s13 }
  0x82   :  { %v1022_v4 = vpop.permute.xlu1 %54  ;;  %v1024_v5 = vpop.permute.xlu0 %48 }
  0x84   :  { %291 = vrot.lane.b32.xlu1 %v959_v2, %s851_s14  ;;  %289 = vrot.lane.b32.xlu0 %v964_v3, %s851_s14 }
  0x86   :  { %v1040_v8 = vpop.permute.xlu1 %56  ;;  %v1042_v9 = vpop.permute.xlu0 %50 }
  0x88   :  { %341 = vrot.lane.b32.xlu1 %v1033_v6, %s838_s3  ;;  %339 = vrot.lane.b32.xlu0 %v1038_v7, %s838_s3 }
  0x8a   :  { %v1048_v10 = vpop.permute.xlu1 %62  ;;  %v1050_v11 = vpop.permute.xlu0 %60 }
  0x8c   :  { %347 = vrot.lane.b32.xlu1 %v1033_v6, %s837_s25  ;;  %345 = vrot.lane.b32.xlu0 %v1038_v7, %s837_s25 }
  0x8e   :  { %v1056_v12 = vpop.permute.xlu1 %68  ;;  %v1058_v13 = vpop.permute.xlu0 %66 }
  0x90   :  { %353 = vrot.lane.b32.xlu1 %v1033_v6, %s839_s28  ;;  %351 = vrot.lane.b32.xlu0 %v1038_v7, %s839_s28 }
  0x92   :  { %v1064_v14 = vpop.permute.xlu1 %74  ;;  %v1066_v15 = vpop.permute.xlu0 %72 }
  0x94   :  { %359 = vrot.lane.b32.xlu1 %v1033_v6, %s840_s29  ;;  %357 = vrot.lane.b32.xlu0 %v1038_v7, %s840_s29 }
  0x96   :  { %v1072_v16 = vpop.permute.xlu1 %80  ;;  %v1074_v17 = vpop.permute.xlu0 %78 }
  0x98   :  { %365 = vrot.lane.b32.xlu1 %v1033_v6, %s841_s0  ;;  %363 = vrot.lane.b32.xlu0 %v1038_v7, %s841_s0 }
  0x9a   :  { %v1080_v18 = vpop.permute.xlu1 %86  ;;  %v1082_v19 = vpop.permute.xlu0 %84 }
  0x9c   :  { %371 = vrot.lane.b32.xlu1 %v1033_v6, %s842_s30  ;;  %369 = vrot.lane.b32.xlu0 %v1038_v7, %s842_s30 }
  0x9e   :  { %v1088_v20 = vpop.permute.xlu1 %92  ;;  %v1090_v21 = vpop.permute.xlu0 %90 }
  0xa0   :  { %377 = vrot.lane.b32.xlu1 %v1033_v6, %s843_s6  ;;  %375 = vrot.lane.b32.xlu0 %v1038_v7, %s843_s6 }
  0xa2   :  { %v1096_v22 = vpop.permute.xlu1 %98  ;;  %v1098_v23 = vpop.permute.xlu0 %96 }
  0xa4   :  { %383 = vrot.lane.b32.xlu1 %v1033_v6, %s844_s7  ;;  %381 = vrot.lane.b32.xlu0 %v1038_v7, %s844_s7 }
  0xa6   :  { %v1104_v24 = vpop.permute.xlu1 %104  ;;  %v1106_v25 = vpop.permute.xlu0 %102 }
  0xa8   :  { %389 = vrot.lane.b32.xlu1 %v1033_v6, %s845_s8  ;;  %387 = vrot.lane.b32.xlu0 %v1038_v7, %s845_s8 }
  0xaa   :  { %v1112_v26 = vpop.permute.xlu1 %110  ;;  %v1114_v27 = vpop.permute.xlu0 %108 }
  0xac   :  { %395 = vrot.lane.b32.xlu1 %v1033_v6, %s846_s9  ;;  %393 = vrot.lane.b32.xlu0 %v1038_v7, %s846_s9 }
  0xae   :  { %v1120_v28 = vpop.permute.xlu1 %116  ;;  %v1122_v29 = vpop.permute.xlu0 %114 }
  0xb0   :  { %401 = vrot.lane.b32.xlu1 %v1033_v6, %s847_s10  ;;  %399 = vrot.lane.b32.xlu0 %v1038_v7, %s847_s10 }
  0xb2   :  { %v1128_v30 = vpop.permute.xlu1 %122  ;;  %v1130_v31 = vpop.permute.xlu0 %120 }
  0xb4   :  { %407 = vrot.lane.b32.xlu1 %v1033_v6, %s848_s11  ;;  %405 = vrot.lane.b32.xlu0 %v1038_v7, %s848_s11 }
  0xb6   :  { %v1136_v32 = vpop.permute.xlu1 %128  ;;  %v1138_v33 = vpop.permute.xlu0 %126 }
  0xb7   :  { %1576 = vst [vmem:[#allocation9_spill] sm:$0xff] %v1138_v33 }
  0xb8   :  { %413 = vrot.lane.b32.xlu1 %v1033_v6, %s849_s12  ;;  %411 = vrot.lane.b32.xlu0 %v1038_v7, %s849_s12 }
  0xba   :  { %v1144_v34 = vpop.permute.xlu1 %134  ;;  %v1146_v35 = vpop.permute.xlu0 %132 }
  0xbb   :  { %1577 = vst [vmem:[#allocation10_spill] sm:$0xff] %v1146_v35 }
  0xbc   :  { %419 = vrot.lane.b32.xlu1 %v1033_v6, %s850_s13  ;;  %417 = vrot.lane.b32.xlu0 %v1038_v7, %s850_s13 }
  0xbe   :  { %v208_v36 = vpop.permute.xlu1 %207  ;;  %v206_v37 = vpop.permute.xlu0 %205 }
  0xbf   :  { %v296_v60 = vsel %vm138_vm0, %v959_v2, %v208_v36  ;;  %v295_v61 = vsel %vm138_vm0, %v964_v3, %v206_v37 }
  0xc0   :  { %425 = vrot.lane.b32.xlu1 %v1033_v6, %s851_s14  ;;  %423 = vrot.lane.b32.xlu0 %v1038_v7, %s851_s14 }
  0xc2   :  { %v214_v40 = vpop.permute.xlu1 %213  ;;  %v212_v41 = vpop.permute.xlu0 %211 }
  0xc3   :  { %v298_v62 = vsel %vm141_vm1, %v296_v60, %v214_v40  ;;  %v297_v63 = vsel %vm141_vm1, %v295_v61, %v212_v41 }
  0xc4   :  { %475 = vrot.lane.b32.xlu1 %v1159_v38, %s838_s3  ;;  %473 = vrot.lane.b32.xlu0 %v1164_v39, %s838_s3 }
  0xc6   :  { %v220_v42 = vpop.permute.xlu1 %219  ;;  %v218_v43 = vpop.permute.xlu0 %217 }
  0xc7   :  { %v300_v35 = vsel %vm144_vm2, %v298_v62, %v220_v42  ;;  %v299_v33 = vsel %vm144_vm2, %v297_v63, %v218_v43 }
  0xc8   :  { %481 = vrot.lane.b32.xlu1 %v1159_v38, %s837_s25  ;;  %479 = vrot.lane.b32.xlu0 %v1164_v39, %s837_s25 }
  0xca   :  { %v226_v44 = vpop.permute.xlu1 %225  ;;  %v224_v45 = vpop.permute.xlu0 %223 }
  0xcb   :  { %v302_v2 = vsel %vm147_vm3, %v300_v35, %v226_v44  ;;  %v301_v3 = vsel %vm147_vm3, %v299_v33, %v224_v45 }
  0xcc   :  { %487 = vrot.lane.b32.xlu1 %v1159_v38, %s839_s28  ;;  %485 = vrot.lane.b32.xlu0 %v1164_v39, %s839_s28 }
  0xce   :  { %v232_v46 = vpop.permute.xlu1 %231  ;;  %v230_v47 = vpop.permute.xlu0 %229 }
  0xcf   :  { %v304_v40 = vsel %vm150_vm4, %v302_v2, %v232_v46  ;;  %v303_v41 = vsel %vm150_vm4, %v301_v3, %v230_v47 }
  0xd0   :  { %493 = vrot.lane.b32.xlu1 %v1159_v38, %s840_s29  ;;  %491 = vrot.lane.b32.xlu0 %v1164_v39, %s840_s29 }
  0xd2   :  { %v238_v48 = vpop.permute.xlu1 %237  ;;  %v236_v49 = vpop.permute.xlu0 %235 }
  0xd3   :  { %v306_v60 = vsel %vm153_vm5, %v304_v40, %v238_v48  ;;  %v305_v61 = vsel %vm153_vm5, %v303_v41, %v236_v49 }
  0xd4   :  { %499 = vrot.lane.b32.xlu1 %v1159_v38, %s841_s0  ;;  %497 = vrot.lane.b32.xlu0 %v1164_v39, %s841_s0 }
  0xd6   :  { %v244_v50 = vpop.permute.xlu1 %243  ;;  %v242_v51 = vpop.permute.xlu0 %241 }
  0xd7   :  { %v308_v33 = vsel %vm156_vm6, %v306_v60, %v244_v50  ;;  %v307_v35 = vsel %vm156_vm6, %v305_v61, %v242_v51 }
  0xd8   :  { %505 = vrot.lane.b32.xlu1 %v1159_v38, %s842_s30  ;;  %503 = vrot.lane.b32.xlu0 %v1164_v39, %s842_s30 }
  0xda   :  { %v250_v53 = vpop.permute.xlu1 %249  ;;  %v248_v54 = vpop.permute.xlu0 %247 }
  0xdb   :  { %v310_v42 = vsel %vm159_vm7, %v308_v33, %v250_v53  ;;  %v309_v43 = vsel %vm159_vm7, %v307_v35, %v248_v54 }
  0xdc   :  { %607 = vrot.lane.b32.xlu1 %v1193_v52, %s838_s3  ;;  %509 = vrot.lane.b32.xlu0 %v1164_v39, %s843_s6 }
  0xde   :  { %v256_v56 = vpop.permute.xlu1 %255  ;;  %v254_v57 = vpop.permute.xlu0 %253 }
  0xdf   :  { %v312_v46 = vsel %vm162_vm8, %v310_v42, %v256_v56  ;;  %v311_v47 = vsel %vm162_vm8, %v309_v43, %v254_v57 }
  0xe0   :  { %613 = vrot.lane.b32.xlu1 %v1193_v52, %s837_s25  ;;  %609 = vrot.lane.b32.xlu0 %v1202_v55, %s838_s3  ;;  %s1375_s3 = sld [smem:[#allocation3 + $0x1]] }
  0xe2   :  { %v262_v58 = vpop.permute.xlu1 %261  ;;  %v260_v59 = vpop.permute.xlu0 %259 }
  0xe3   :  { %v314_v48 = vsel %vm165_vm9, %v312_v46, %v262_v58  ;;  %v313_v49 = vsel %vm165_vm9, %v311_v47, %v260_v59 }
  0xe4   :  { %619 = vrot.lane.b32.xlu1 %v1193_v52, %s839_s28  ;;  %615 = vrot.lane.b32.xlu0 %v1202_v55, %s837_s25 }
  0xe6   :  { %v268_v36 = vpop.permute.xlu1 %267  ;;  %v266_v37 = vpop.permute.xlu0 %265 }
  0xe7   :  { %v316_v50 = vsel %vm168_vm10, %v314_v48, %v268_v36  ;;  %v315_v51 = vsel %vm168_vm10, %v313_v49, %v266_v37 }
  0xe8   :  { %625 = vrot.lane.b32.xlu1 %v1193_v52, %s840_s29  ;;  %621 = vrot.lane.b32.xlu0 %v1202_v55, %s839_s28  ;;  %s763_s28 = sld [smem:[#allocation3 + $0x2]] }
  0xea   :  { %v274_v44 = vpop.permute.xlu1 %273  ;;  %v272_v45 = vpop.permute.xlu0 %271 }
  0xeb   :  { %v318_v53 = vsel %vm171_vm11, %v316_v50, %v274_v44  ;;  %v317_v54 = vsel %vm171_vm11, %v315_v51, %v272_v45  ;;  %v140_v44 = vsel %vm138_vm0, %v898_v1, %v1042_v9 }
  0xec   :  { %511 = vrot.lane.b32.xlu1 %v1159_v38, %s843_s6  ;;  %627 = vrot.lane.b32.xlu0 %v1202_v55, %s840_s29  ;;  %s764_s29 = sld [smem:[#allocation3 + $0x3]] }
  0xee   :  { %v280_v56 = vpop.permute.xlu1 %279  ;;  %v278_v57 = vpop.permute.xlu0 %277 }
  0xef   :  { %v320_v58 = vsel %vm174_vm12, %v318_v53, %v280_v56  ;;  %v319_v59 = vsel %vm174_vm12, %v317_v54, %v278_v57 }
  0xf0   :  { %633 = vrot.lane.b32.xlu1 %v1202_v55, %s841_s0  ;;  %631 = vrot.lane.b32.xlu0 %v1193_v52, %s841_s0 }
  0xf2   :  { %v286_v62 = vpop.permute.xlu1 %285  ;;  %v284_v63 = vpop.permute.xlu0 %283 }
  0xf3   :  { %v322_v2 = vsel %vm177_vm13, %v320_v58, %v286_v62  ;;  %v321_v3 = vsel %vm177_vm13, %v319_v59, %v284_v63 }
  0xf4   :  { %517 = vrot.lane.b32.xlu1 %v1159_v38, %s844_s7  ;;  %515 = vrot.lane.b32.xlu0 %v1164_v39, %s844_s7 }
  0xf6   :  { %v292_v36 = vpop.permute.xlu1 %291  ;;  %v290_v37 = vpop.permute.xlu0 %289 }
  0xf7   :  { %v1259_v40 = vsel %vm180_vm14, %v322_v2, %v292_v36  ;;  %v1262_v41 = vsel %vm180_vm14, %v321_v3, %v290_v37  ;;  %v761_v3 = vld [vmem:[%s1571_s1] ss:$0 sm:$0xff]  ;;  %s1371_s1 = sld [smem:[#allocation3]] }
  0xf8   :  { %639 = vrot.lane.b32.xlu1 %v1202_v55, %s842_s30  ;;  %637 = vrot.lane.b32.xlu0 %v1193_v52, %s842_s30 }
  0xfa   :  { %v342_v60 = vpop.permute.xlu1 %341  ;;  %v340_v61 = vpop.permute.xlu0 %339 }
  0xfb   :  { %v430_v33 = vsel %vm138_vm0, %v1033_v6, %v342_v60  ;;  %v429_v35 = vsel %vm138_vm0, %v1038_v7, %v340_v61  ;;  %v139_v6 = vsel %vm138_vm0, %v889_v0, %v1024_v5  ;;  %v143_v7 = vsel %vm141_vm1, %v140_v44, %v1040_v8 }
  0xfc   :  { %523 = vrot.lane.b32.xlu1 %v1159_v38, %s845_s8  ;;  %521 = vrot.lane.b32.xlu0 %v1164_v39, %s845_s8  ;;  %v146_v1 = vsel %vm144_vm2, %v143_v7, %v1048_v10  ;;  %v142_v50 = vsel %vm141_vm1, %v139_v6, %v1022_v4 }
  0xfd   :  { %v149_v51 = vsel %vm147_vm3, %v146_v1, %v1056_v12  ;;  %v145_v0 = vsel %vm144_vm2, %v142_v50, %v1050_v11 }
  0xfe   :  { %v348_v42 = vpop.permute.xlu1 %347  ;;  %v346_v43 = vpop.permute.xlu0 %345  ;;  %v152_v5 = vsel %vm150_vm4, %v149_v51, %v1064_v14  ;;  %v148_v8 = vsel %vm147_vm3, %v145_v0, %v1058_v13  ;;  %v330_v51 = vstv %s1375_s3 }
  0xff   :  { %v432_v45 = vsel %vm141_vm1, %v430_v33, %v348_v42  ;;  %v431_v46 = vsel %vm141_vm1, %v429_v35, %v346_v43  ;;  %v155_v4 = vsel %vm153_vm5, %v152_v5, %v1072_v16  ;;  %v151_v53 = vsel %vm150_vm4, %v148_v8, %v1066_v15 }
 0x100   :  { %645 = vrot.lane.b32.xlu1 %v1202_v55, %s843_s6  ;;  %643 = vrot.lane.b32.xlu0 %v1193_v52, %s843_s6  ;;  %v158_v54 = vsel %vm156_vm6, %v155_v4, %v1080_v18  ;;  %v154_v14 = vsel %vm153_vm5, %v151_v53, %v1074_v17  ;;  %s852_s6 = smov [#allocation6]  }
 0x101   :  { %v161_v13 = vsel %vm159_vm7, %v158_v54, %v1088_v20  ;;  %v157_v15 = vsel %vm156_vm6, %v154_v14, %v1082_v19 }
 0x102   :  { %v354_v47 = vpop.permute.xlu1 %353  ;;  %v352_v48 = vpop.permute.xlu0 %351  ;;  %v164_v16 = vsel %vm162_vm8, %v161_v13, %v1096_v22  ;;  %v160_v18 = vsel %vm159_vm7, %v157_v15, %v1090_v21 }
 0x103   :  { %v434_v9 = vsel %vm144_vm2, %v432_v45, %v354_v47  ;;  %v433_v49 = vsel %vm144_vm2, %v431_v46, %v352_v48  ;;  %v167_v17 = vsel %vm165_vm9, %v164_v16, %v1104_v24  ;;  %v163_v58 = vsel %vm162_vm8, %v160_v18, %v1098_v23 }
 0x104   :  { %529 = vrot.lane.b32.xlu1 %v1159_v38, %s846_s9  ;;  %527 = vrot.lane.b32.xlu0 %v1164_v39, %s846_s9  ;;  %v170_v59 = vsel %vm168_vm10, %v167_v17, %v1112_v26  ;;  %v166_v22 = vsel %vm165_vm9, %v163_v58, %v1106_v25 }
 0x105   :  { %v173_v21 = vsel %vm171_vm11, %v170_v59, %v1120_v28  ;;  %v169_v23 = vsel %vm168_vm10, %v166_v22, %v1114_v27 }
 0x106   :  { %v360_v10 = vpop.permute.xlu1 %359  ;;  %v358_v12 = vpop.permute.xlu0 %357  ;;  %v176_v24 = vsel %vm174_vm12, %v173_v21, %v1128_v30  ;;  %v172_v26 = vsel %vm171_vm11, %v169_v23, %v1122_v29  ;;  %v1578_v29 = vld [vmem:[#allocation9_spill] sm:$0xff] }
 0x107   :  { %v436_v56 = vsel %vm147_vm3, %v434_v9, %v360_v10  ;;  %v435_v11 = vsel %vm147_vm3, %v433_v49, %v358_v12  ;;  %v179_v25 = vsel %vm177_vm13, %v176_v24, %v1136_v32  ;;  %v175_v2 = vsel %vm174_vm12, %v172_v26, %v1130_v31  ;;  %v1579_v31 = vld [vmem:[#allocation10_spill] sm:$0xff] }
 0x108   :  { %651 = vrot.lane.b32.xlu1 %v1202_v55, %s844_s7  ;;  %649 = vrot.lane.b32.xlu0 %v1193_v52, %s844_s7  ;;  %v182_v27 = vsel %vm180_vm14, %v179_v25, %v1144_v34  ;;  %v178_v37 = vsel %vm177_vm13, %v175_v2, %v1578_v29  ;;  %v196_v9 = vstv %s1371_s1  ;;  %s752_s7 = sshll.u32 %s852_s6, 4  ;;  %s753_s7 = int_to_ptr.vmem [resolvable:$true] %s752_s7 }
 0x109   :  { %v181_v32 = vsel %vm180_vm14, %v178_v37, %v1579_v31  ;;  %v190_v60 = vsub.f32 %v182_v27, %v761_v3  ;;  %p815_p6 = scmp.lt.s32.totalorder %s753_s7, %s753_s7 }
 0x10a   :  { %v366_v57 = vpop.permute.xlu1 %365  ;;  %v364_v20 = vpop.permute.xlu0 %363  ;;  %v189_v42 = vsub.f32 %v181_v32, %v761_v3 }
 0x10b   :  { %v438_v62 = vsel %vm150_vm4, %v436_v56, %v366_v57  ;;  %v437_v19 = vsel %vm150_vm4, %v435_v11, %v364_v20  ;;  %v192_v43 = vmul.f32 %v190_v60, %v190_v60 }
 0x10c   :  { %535 = vrot.lane.b32.xlu1 %v1159_v38, %s847_s10  ;;  %533 = vrot.lane.b32.xlu0 %v1164_v39, %s847_s10  ;;  %v191_v7 = vmul.f32 %v189_v42, %v189_v42 }
 0x10d   :  { %v1387_v47 = vmul.f32 -0.5, %v192_v43 }
 0x10e   :  { %v372_v63 = vpop.permute.xlu1 %371  ;;  %v370_v28 = vpop.permute.xlu0 %369  ;;  %v1393_v0 = vmul.f32 -0.5, %v191_v7 }
 0x10f   :  { %v440_v30 = vsel %vm153_vm5, %v438_v62, %v372_v63  ;;  %v439_v36 = vsel %vm153_vm5, %v437_v19, %v370_v28  ;;  %v198_v5 = vmul.f32 %v196_v9, %v1387_v47  ;;  %v332_v10 = vmul.f32 %v330_v51, %v1387_v47 }
 0x110   :  { %657 = vrot.lane.b32.xlu1 %v1202_v55, %s845_s8  ;;  %655 = vrot.lane.b32.xlu0 %v1193_v52, %s845_s8  ;;  %v197_v54 = vmul.f32 %v196_v9, %v1393_v0  ;;  %v331_v56 = vmul.f32 %v330_v51, %v1393_v0  ;;  %s810_s8 = scalar_lea.vmem %s753_s7, 16 }
 0x111   :  { %v201_v11 = vmul.f32 1.442695, %v198_v5  ;;  %v335_v15 = vmul.f32 1.442695, %v332_v10  ;;  %p811_p5 = scmp.ne.s32.totalorder %s753_s7, %s810_s8 }
 0x112   :  { %v378_v61 = vpop.permute.xlu1 %377  ;;  %v376_v33 = vpop.permute.xlu0 %375  ;;  %v199_v17 = vmul.f32 1.442695, %v197_v54  ;;  %v333_v57 = vmul.f32 1.442695, %v331_v56 }
 0x113   :  { %v442_v34 = vsel %vm156_vm6, %v440_v30, %v378_v61  ;;  %v441_v35 = vsel %vm156_vm6, %v439_v36, %v376_v33  ;;  %782 = vpow2.f32 %v201_v11 }
 0x114   :  { %541 = vrot.lane.b32.xlu1 %v1159_v38, %s848_s11  ;;  %539 = vrot.lane.b32.xlu0 %v1164_v39, %s848_s11  ;;  %784 = vpow2.f32 %v335_v15 }
 0x115   :  { %786 = vpow2.f32 %v199_v17 }
 0x116   :  { %v384_v44 = vpop.permute.xlu1 %383  ;;  %v382_v45 = vpop.permute.xlu0 %381  ;;  %788 = vpow2.f32 %v333_v57 }
 0x117   :  { %v444_v46 = vsel %vm159_vm7, %v442_v34, %v384_v44  ;;  %v443_v6 = vsel %vm159_vm7, %v441_v35, %v382_v45 }
 0x118   :  { %663 = vrot.lane.b32.xlu1 %v1202_v55, %s846_s9  ;;  %661 = vrot.lane.b32.xlu0 %v1193_v52, %s846_s9  ;;  %s814_s9 = scalar_lea.vmem %s753_s7, 32 }
 0x119   :  { %p816_p7 = scmp.lt.s32.totalorder %s814_s9, %s810_s8 }
 0x11a   :  { %v390_v48 = vpop.permute.xlu1 %389  ;;  %v388_v1 = vpop.permute.xlu0 %387 }
 0x11b   :  { %v446_v49 = vsel %vm162_vm8, %v444_v46, %v390_v48  ;;  %v445_v50 = vsel %vm162_vm8, %v443_v6, %v388_v1  ;;  %p817_p8 = por %p816_p7, %p815_p6 }
 0x11c   :  { %547 = vrot.lane.b32.xlu1 %v1159_v38, %s849_s12  ;;  %545 = vrot.lane.b32.xlu0 %v1164_v39, %s849_s12 }
 0x11d   :  { %v783_v28 = vpop.eup %782  ;;  %p818_p9 = pnand %p817_p8, %p811_p5 }
 0x11e   :  { %v396_v8 = vpop.permute.xlu1 %395  ;;  %v394_v4 = vpop.permute.xlu0 %393  ;;  %v326_v29 = vmul.f32 %v783_v28, %v1259_v40 }
 0x11f   :  { %v448_v12 = vsel %vm165_vm9, %v446_v49, %v396_v8  ;;  %v447_v53 = vsel %vm165_vm9, %v445_v50, %v394_v4  ;;  %v785_v2 = vpop.eup %784 }
 0x120   :  { %669 = vrot.lane.b32.xlu1 %v1202_v55, %s847_s10  ;;  %667 = vrot.lane.b32.xlu0 %v1193_v52, %s847_s10  ;;  %v787_v3 = vpop.eup %786 }
 0x121   :  { %v789_v36 = vpop.eup %788  ;;  %v325_v32 = vmul.f32 %v787_v3, %v1262_v41 }
 0x122   :  { %v402_v14 = vpop.permute.xlu1 %401  ;;  %v400_v13 = vpop.permute.xlu0 %399 }
 0x123   :  { %v450_v16 = vsel %vm168_vm10, %v448_v12, %v402_v14  ;;  %v449_v18 = vsel %vm168_vm10, %v447_v53, %v400_v13 }
 0x124   :  { %553 = vrot.lane.b32.xlu1 %v1159_v38, %s850_s13  ;;  %551 = vrot.lane.b32.xlu0 %v1164_v39, %s850_s13 }
 0x126   :  { %v408_v20 = vpop.permute.xlu1 %407  ;;  %v406_v58 = vpop.permute.xlu0 %405 }
 0x127   :  { %v452_v59 = vsel %vm171_vm11, %v450_v16, %v408_v20  ;;  %v451_v62 = vsel %vm171_vm11, %v449_v18, %v406_v58 }
 0x128   :  { %675 = vrot.lane.b32.xlu1 %v1202_v55, %s848_s11  ;;  %673 = vrot.lane.b32.xlu0 %v1193_v52, %s848_s11 }
 0x12a   :  { %v414_v19 = vpop.permute.xlu1 %413  ;;  %v412_v22 = vpop.permute.xlu0 %411 }
 0x12b   :  { %v454_v21 = vsel %vm174_vm12, %v452_v59, %v414_v19  ;;  %v453_v23 = vsel %vm174_vm12, %v451_v62, %v412_v22 }
 0x12c   :  { %559 = vrot.lane.b32.xlu1 %v1159_v38, %s851_s14  ;;  %557 = vrot.lane.b32.xlu0 %v1164_v39, %s851_s14 }
 0x12e   :  { %v420_v24 = vpop.permute.xlu1 %419  ;;  %v418_v26 = vpop.permute.xlu0 %417 }
 0x12f   :  { %v456_v25 = vsel %vm177_vm13, %v454_v21, %v420_v24  ;;  %v455_v63 = vsel %vm177_vm13, %v453_v23, %v418_v26 }
 0x130   :  { %681 = vrot.lane.b32.xlu1 %v1202_v55, %s849_s12  ;;  %679 = vrot.lane.b32.xlu0 %v1193_v52, %s849_s12 }
 0x132   :  { %v426_v27 = vpop.permute.xlu1 %425  ;;  %v424_v30 = vpop.permute.xlu0 %423 }
 0x133   :  { %v458_v37 = vsel %vm180_vm14, %v456_v25, %v426_v27  ;;  %v457_v31 = vsel %vm180_vm14, %v455_v63, %v424_v30 }
 0x134   :  { %v460_v60 = vmul.f32 %v785_v2, %v458_v37  ;;  %v459_v61 = vmul.f32 %v789_v36, %v457_v31  ;;  %687 = vrot.lane.b32.xlu1 %v1202_v55, %s850_s13  ;;  %685 = vrot.lane.b32.xlu0 %v1193_v52, %s850_s13 }
 0x136   :  { %v1441_v33 = vadd.f32 %v460_v60, %v326_v29  ;;  %v1443_v34 = vadd.f32 %v459_v61, %v325_v32  ;;  %v476_v35 = vpop.permute.xlu1 %475  ;;  %v474_v40 = vpop.permute.xlu0 %473 }
 0x137   :  { %v564_v41 = vsel %vm138_vm0, %v1159_v38, %v476_v35  ;;  %v563_v42 = vsel %vm138_vm0, %v1164_v39, %v474_v40 }
 0x138   :  { %693 = vrot.lane.b32.xlu1 %v1202_v55, %s851_s14  ;;  %691 = vrot.lane.b32.xlu0 %v1193_v52, %s851_s14 }
 0x13a   :  { %v482_v43 = vpop.permute.xlu1 %481  ;;  %v480_v44 = vpop.permute.xlu0 %479 }
 0x13b   :  { %v566_v45 = vsel %vm141_vm1, %v564_v41, %v482_v43  ;;  %v565_v46 = vsel %vm141_vm1, %v563_v42, %v480_v44  ;;  %v464_v43 = vstv %s763_s28 }
 0x13e   :  { %v488_v6 = vpop.permute.xlu1 %487  ;;  %v486_v7 = vpop.permute.xlu0 %485 }
 0x13f   :  { %v568_v48 = vsel %vm144_vm2, %v566_v45, %v488_v6  ;;  %v567_v1 = vsel %vm144_vm2, %v565_v46, %v486_v7  ;;  %v466_v46 = vmul.f32 %v464_v43, %v1387_v47  ;;  %v465_v6 = vmul.f32 %v464_v43, %v1393_v0 }
 0x142   :  { %v494_v9 = vpop.permute.xlu1 %493  ;;  %v492_v49 = vpop.permute.xlu0 %491 }
 0x143   :  { %v570_v50 = vsel %vm147_vm3, %v568_v48, %v494_v9  ;;  %v569_v38 = vsel %vm147_vm3, %v567_v1, %v492_v49  ;;  %v469_v1 = vmul.f32 1.442695, %v466_v46  ;;  %v467_v9 = vmul.f32 1.442695, %v465_v6 }
 0x145   :  { %790 = vpow2.f32 %v469_v1 }
 0x146   :  { %v500_v51 = vpop.permute.xlu1 %499  ;;  %v498_v39 = vpop.permute.xlu0 %497  ;;  %792 = vpow2.f32 %v467_v9 }
 0x147   :  { %v572_v5 = vsel %vm150_vm4, %v570_v50, %v500_v51  ;;  %v571_v8 = vsel %vm150_vm4, %v569_v38, %v498_v39  ;;  %v598_v38 = vstv %s764_s29 }
 0x14a   :  { %v506_v4 = vpop.permute.xlu1 %505  ;;  %v504_v10 = vpop.permute.xlu0 %503 }
 0x14b   :  { %v574_v12 = vsel %vm153_vm5, %v572_v5, %v506_v4  ;;  %v573_v53 = vsel %vm153_vm5, %v571_v8, %v504_v10  ;;  %v600_v5 = vmul.f32 %v598_v38, %v1387_v47  ;;  %v599_v10 = vmul.f32 %v598_v38, %v1393_v0 }
 0x14d   :  { %v601_v0 = vmul.f32 1.442695, %v599_v10 }
 0x14e   :  { %v608_v54 = vpop.permute.xlu1 %607  ;;  %v510_v56 = vpop.permute.xlu0 %509 }
 0x14f   :  { %v575_v11 = vsel %vm156_vm6, %v573_v53, %v510_v56  ;;  %v697_v14 = vsel %vm138_vm0, %v1193_v52, %v608_v54 }
 0x152   :  { %v614_v13 = vpop.permute.xlu1 %613  ;;  %v610_v15 = vpop.permute.xlu0 %609 }
 0x153   :  { %v699_v16 = vsel %vm141_vm1, %v697_v14, %v614_v13  ;;  %v698_v18 = vsel %vm138_vm0, %v1202_v55, %v610_v15  ;;  %vm744_vm0 = vcmask 516096  }
 0x156   :  { %v620_v17 = vpop.permute.xlu1 %619  ;;  %v616_v57 = vpop.permute.xlu0 %615 }
 0x157   :  { %v701_v20 = vsel %vm144_vm2, %v699_v16, %v620_v17  ;;  %v700_v58 = vsel %vm141_vm1, %v698_v18, %v616_v57  ;;  %v603_v16 = vmul.f32 1.442695, %v600_v5 }
 0x159   :  { %794 = vpow2.f32 %v603_v16 }
 0x15a   :  { %v626_v59 = vpop.permute.xlu1 %625  ;;  %v622_v62 = vpop.permute.xlu0 %621  ;;  %796 = vpow2.f32 %v601_v0 }
 0x15b   :  { %v1472_v19 = vsel %vm147_vm3, %v701_v20, %v626_v59  ;;  %v702_v52 = vsel %vm144_vm2, %v700_v58, %v622_v62  ;;  %v791_v20 = vpop.eup %790 }
 0x15e   :  { %v512_v22 = vpop.permute.xlu1 %511  ;;  %v628_v21 = vpop.permute.xlu0 %627 }
 0x15f   :  { %v576_v23 = vsel %vm156_vm6, %v574_v12, %v512_v22  ;;  %v1477_v24 = vsel %vm147_vm3, %v702_v52, %v628_v21  ;;  %v793_v22 = vpop.eup %792 }
 0x162   :  { %v1479_v55 = vpop.permute.xlu1 %633  ;;  %v1481_v26 = vpop.permute.xlu0 %631 }
 0x166   :  { %v518_v25 = vpop.permute.xlu1 %517  ;;  %v516_v63 = vpop.permute.xlu0 %515 }
 0x167   :  { %v578_v8 = vsel %vm159_vm7, %v576_v23, %v518_v25  ;;  %v577_v4 = vsel %vm159_vm7, %v575_v11, %v516_v63 }
 0x16a   :  { %v1483_v28 = vpop.permute.xlu1 %639  ;;  %v1485_v2 = vpop.permute.xlu0 %637 }
 0x16e   :  { %v524_v3 = vpop.permute.xlu1 %523  ;;  %v522_v27 = vpop.permute.xlu0 %521 }
 0x16f   :  { %v580_v12 = vsel %vm162_vm8, %v578_v8, %v524_v3  ;;  %v579_v53 = vsel %vm162_vm8, %v577_v4, %v522_v27  ;;  %v706_v3 = vsel %vm150_vm4, %v1477_v24, %v1479_v55  ;;  %v705_v27 = vsel %vm150_vm4, %v1472_v19, %v1481_v26 }
 0x172   :  { %v1487_v30 = vpop.permute.xlu1 %645  ;;  %v1489_v36 = vpop.permute.xlu0 %643 }
 0x176   :  { %v530_v29 = vpop.permute.xlu1 %529  ;;  %v528_v37 = vpop.permute.xlu0 %527 }
 0x177   :  { %v582_v54 = vsel %vm165_vm9, %v580_v12, %v530_v29  ;;  %v581_v56 = vsel %vm165_vm9, %v579_v53, %v528_v37  ;;  %v708_v29 = vsel %vm153_vm5, %v706_v3, %v1483_v28  ;;  %v707_v37 = vsel %vm153_vm5, %v705_v27, %v1485_v2 }
 0x178   :  { %v710_v43 = vsel %vm156_vm6, %v708_v29, %v1487_v30  ;;  %v709_v24 = vsel %vm156_vm6, %v707_v37, %v1489_v36 }
 0x17a   :  { %v1491_v31 = vpop.permute.xlu1 %651  ;;  %v1493_v32 = vpop.permute.xlu0 %649 }
 0x17b   :  { %v712_v19 = vsel %vm159_vm7, %v710_v43, %v1491_v31  ;;  %v711_v55 = vsel %vm159_vm7, %v709_v24, %v1493_v32 }
 0x17e   :  { %v536_v60 = vpop.permute.xlu1 %535  ;;  %v534_v61 = vpop.permute.xlu0 %533 }
 0x17f   :  { %v584_v15 = vsel %vm168_vm10, %v582_v54, %v536_v60  ;;  %v583_v47 = vsel %vm168_vm10, %v581_v56, %v534_v61 }
 0x182   :  { %v1495_v35 = vpop.permute.xlu1 %657  ;;  %v1497_v40 = vpop.permute.xlu0 %655 }
 0x183   :  { %v714_v26 = vsel %vm162_vm8, %v712_v19, %v1495_v35 }
 0x186   :  { %v542_v41 = vpop.permute.xlu1 %541  ;;  %v540_v42 = vpop.permute.xlu0 %539 }
 0x187   :  { %v586_v18 = vsel %vm171_vm11, %v584_v15, %v542_v41  ;;  %v585_v11 = vsel %vm171_vm11, %v583_v47, %v540_v42 }
 0x18a   :  { %v664_v44 = vpop.permute.xlu1 %663  ;;  %v662_v45 = vpop.permute.xlu0 %661 }
 0x18e   :  { %v548_v7 = vpop.permute.xlu1 %547  ;;  %v546_v48 = vpop.permute.xlu0 %545 }
 0x18f   :  { %v588_v17 = vsel %vm174_vm12, %v586_v18, %v548_v7  ;;  %v587_v57 = vsel %vm174_vm12, %v585_v11, %v546_v48  ;;  %v795_v7 = vpop.eup %794 }
 0x190   :  { %v797_v1 = vpop.eup %796 }
 0x192   :  { %v670_v49 = vpop.permute.xlu1 %669  ;;  %v668_v50 = vpop.permute.xlu0 %667 }
 0x196   :  { %v554_v51 = vpop.permute.xlu1 %553  ;;  %v552_v39 = vpop.permute.xlu0 %551 }
 0x197   :  { %v590_v58 = vsel %vm177_vm13, %v588_v17, %v554_v51  ;;  %v589_v59 = vsel %vm177_vm13, %v587_v57, %v552_v39 }
 0x19a   :  { %v676_v14 = vpop.permute.xlu1 %675  ;;  %v674_v13 = vpop.permute.xlu0 %673 }
 0x19e   :  { %v560_v62 = vpop.permute.xlu1 %559  ;;  %v558_v52 = vpop.permute.xlu0 %557 }
 0x19f   :  { %v592_v21 = vsel %vm180_vm14, %v590_v58, %v560_v62  ;;  %v591_v23 = vsel %vm180_vm14, %v589_v59, %v558_v52 }
 0x1a0   :  { %v594_v25 = vmul.f32 %v791_v20, %v592_v21  ;;  %v593_v63 = vmul.f32 %v793_v22, %v591_v23 }
 0x1a2   :  { %v596_v60 = vadd.f32 %v594_v25, %v1441_v33  ;;  %v595_v61 = vadd.f32 %v593_v63, %v1443_v34  ;;  %v682_v41 = vpop.permute.xlu1 %681  ;;  %v680_v42 = vpop.permute.xlu0 %679  ;;  %v713_v33 = vsel %vm162_vm8, %v711_v55, %v1497_v40  ;;  %v716_v34 = vsel %vm165_vm9, %v714_v26, %v664_v44 }
 0x1a3   :  { %v715_v28 = vsel %vm165_vm9, %v713_v33, %v662_v45  ;;  %v718_v36 = vsel %vm168_vm10, %v716_v34, %v670_v49 }
 0x1a4   :  { %v717_v46 = vsel %vm168_vm10, %v715_v28, %v668_v50  ;;  %v720_v31 = vsel %vm171_vm11, %v718_v36, %v676_v14  ;;  %v742_v14 = vstv %s1574_s4 }
 0x1a5   :  { %v719_v32 = vsel %vm171_vm11, %v717_v46, %v674_v13  ;;  %v722_v6 = vsel %vm174_vm12, %v720_v31, %v682_v41 }
 0x1a6   :  { %v688_v2 = vpop.permute.xlu1 %687  ;;  %v686_v30 = vpop.permute.xlu0 %685  ;;  %v721_v35 = vsel %vm174_vm12, %v719_v32, %v680_v42 }
 0x1a7   :  { %v724_v40 = vsel %vm177_vm13, %v722_v6, %v688_v2  ;;  %v723_v44 = vsel %vm177_vm13, %v721_v35, %v686_v30 }
 0x1aa   :  { %v694_v45 = vpop.permute.xlu1 %693  ;;  %v692_v48 = vpop.permute.xlu0 %691 }
 0x1ab   :  { %v726_v9 = vsel %vm180_vm14, %v724_v40, %v694_v45  ;;  %v725_v49 = vsel %vm180_vm14, %v723_v44, %v692_v48 }
 0x1ac   :  { %v728_v50 = vmul.f32 %v795_v7, %v726_v9  ;;  %v727_v38 = vmul.f32 %v797_v1, %v725_v49 }
 0x1ae   :  { %v730_v51 = vadd.f32 %v728_v50, %v596_v60  ;;  %v729_v39 = vadd.f32 %v727_v38, %v595_v61 }
 0x1b0   :  { %v733_v5 = vsel %vm731_vm15, %v730_v51, 0.0  ;;  %v732_v8 = vsel %vm731_vm15, %v729_v39, 0.0 }
 0x1b1   :  { %v734_v4 = vadd.f32 %v733_v5, %v732_v8 }
 0x1b3   :  { %v735_v10 = vrot.slane %v734_v4, 4 }
 0x1b5   :  { %v736_v12 = vadd.f32 %v735_v10, %v734_v4 }
 0x1b7   :  { %v737_v53 = vrot.slane %v736_v12, 2 }
 0x1b9   :  { %v738_v54 = vadd.f32 %v737_v53, %v736_v12 }
 0x1bb   :  { %v739_v56 = vrot.slane %v738_v54, 1 }
 0x1bd   :  { %v740_v13 = vadd.f32 %v739_v56, %v738_v54 }
 0x1bf   :  { %v743_v15 = vadd.f32 %v742_v14, %v740_v13 }
 0x1c1   :  { %745 = vst.msk [vmem:[#allocation6] sm:$0x1] %vm744_vm0, %v743_v15 }
 0x1c2   :  { %821 = shalt.err (!%p818_p9)
}
 0x1c3   :  { %s822_s12 = scalar_lea.hbm %s1575_s5, 16 }
 0x1c4   :  { %p823_p10 = scmp.ne.s32.totalorder %s1575_s5, %s822_s12  ;;  %p826_p11 = scmp.lt.u32.totalorder %s822_s12, %s1575_s5 }
 0x1c6   :  { %p828_p12 = pnand %p826_p11, %p823_p10 }
 0x1c8   :  { %831 = shalt.err (!%p828_p12)
}
 0x1c9   :  { %755 = dma.vmem_to_hbm [thread:$0]  %s753_s7, 16, %s1575_s5, [#allocation4]  }
 0x1ca   :  { %834 = dma.done.wait [#allocation4], 16  }
 0x1cb   :  { %835 = vsyncadd [#allocation4], 4294967280 }
 0x1cc   :  { %759 = vsyncpa [#allocation4], 1 }
 0x1cd   :  { %760 = vsyncpa [#allocation5], 1 }

</bundles_post_ra>
